<compile_context>
chip_gen: v7x
topology: tpu7x:2x2x1
jax: 0.10.0
libtpu: 0.0.40
codegen_flags: <defaults>
</compile_context>

<pallas_src>
import functools

import jax
import jax.numpy as jnp
from jax.experimental import pallas as pl
from jax.experimental.pallas import tpu as pltpu


def _kd_kernel(*refs, alpha, c_t, hw, tile_m, has_mask, accumulate):
    if has_mask:
        x_ref, t_ref, m_ref, out_ref = refs
    else:
        x_ref, t_ref, out_ref = refs
        m_ref = None

    # Narrow inputs to the first c_t channels (static sublane slice, no copy).
    x = x_ref[0:c_t, :].astype(jnp.float32)           # (c_t, tile_m)
    t = t_ref[...].astype(jnp.float32) * alpha        # (c_t, tile_m)

    # log_softmax over the channel (sublane) axis.
    x_max = jnp.max(x, axis=0, keepdims=True)
    x_sh = x - x_max
    lse = jnp.log(jnp.sum(jnp.exp(x_sh), axis=0, keepdims=True))
    log_p = x_sh - lse                                # (c_t, tile_m)

    # softmax(alpha * targets) fused with the channel mean:
    #   mean_c(log_p * softmax(t)) = sum_c(log_p * e^(t-max)) /
    #                                (C * sum_c(e^(t-max)))
    t_exp = jnp.exp(t - jnp.max(t, axis=0, keepdims=True))
    t_sum = jnp.sum(t_exp, axis=0, keepdims=True)         # (1, tile_m)
    num = jnp.sum(log_p * t_exp, axis=0, keepdims=True)   # (1, tile_m)
    loss = -num / (t_sum * jnp.float32(c_t))              # negated, (1, tile_m)

    if has_mask:
        loss = loss * m_ref[...].astype(jnp.float32)

    if accumulate:
        # Zero out the spatial-tail lanes of the last (partial) tile.
        if hw % tile_m != 0:
            j = pl.program_id(1)
            lane = jax.lax.broadcasted_iota(jnp.int32, (1, tile_m), 1)
            loss = jnp.where(j * tile_m + lane < hw, loss, 0.0)

        @pl.when(pl.program_id(1) == 0)
        def _():
            out_ref[...] = jnp.zeros_like(out_ref)

        out_ref[...] += loss          # resident (1, tile_m) vector accumulator
    else:
        out_ref[...] = loss           # per-lane loss row ('none' reduction)


def _round_up(v, m):
    return (v + m - 1) // m * m


def knowledge_distillation_loss(inputs, targets, gt=None, mask=None,
                                reduction="mean", alpha=1.0,
                                tile_m_target=4096,
                                tile_vmem_budget_bytes=8 * 1024 * 1024):
    """Forward pass of KnowledgeDistillationLoss.

    inputs  : (N, C_in, H, W)
    targets : (N, C_t, H, W) with C_t <= C_in
    gt      : unused (kept for API parity with the PyTorch module)
    mask    : optional (N, H, W)
    """
    del gt  # unused in the reference forward pass
    n, c_in, h, w = inputs.shape
    c_t = targets.shape[1]
    hw = h * w
    has_mask = mask is not None

    # Free reshapes only (contiguous dims merged) -- no extra HBM pass.
    x = inputs.reshape(n, c_in, hw)
    t = targets.reshape(n, c_t, hw)

    # ---- tile size: as large as fits a conservative VMEM budget ------------
    itemsize = 4  # budget as f32 (covers bf16 inputs too)
    cols_bytes = 2 * (_round_up(c_in, 8) + _round_up(c_t, 8)
                      + (8 if has_mask else 0)) * itemsize   # double-buffered
    tile_m = max(128, min(tile_m_target, tile_vmem_budget_bytes // cols_bytes))
    tile_m = (tile_m // 128) * 128
    if hw <= tile_m:
        tile_m = hw                    # single lane-dense tile per batch elem
    n_j = pl.cdiv(hw, tile_m)
    grid = (n, n_j)

    in_specs = [
        pl.BlockSpec((pl.Squeezed(), c_in, tile_m), lambda nb, j: (nb, 0, j)),
        pl.BlockSpec((pl.Squeezed(), c_t, tile_m), lambda nb, j: (nb, 0, j)),
    ]
    args = [x, t]
    if has_mask:
        in_specs.append(
            pl.BlockSpec((pl.Squeezed(), 1, tile_m), lambda nb, j: (nb, 0, j)))
        args.append(mask.reshape(n, 1, hw).astype(jnp.float32))

    accumulate = reduction in ("mean", "sum")
    if accumulate:
        # Per-batch vector partial sums; only N*tile_m floats hit HBM.
        out_shape = jax.ShapeDtypeStruct((n, 1, tile_m), jnp.float32)
        out_specs = pl.BlockSpec((pl.Squeezed(), 1, tile_m),
                                 lambda nb, j: (nb, 0, 0))
        dims = ("parallel", "arbitrary")
    else:
        out_shape = jax.ShapeDtypeStruct((n, 1, hw), jnp.float32)
        out_specs = pl.BlockSpec((pl.Squeezed(), 1, tile_m),
                                 lambda nb, j: (nb, 0, j))
        dims = ("parallel", "parallel")

    kernel = functools.partial(
        _kd_kernel, alpha=float(alpha), c_t=c_t, hw=hw, tile_m=tile_m,
        has_mask=has_mask, accumulate=accumulate)

    out = pl.pallas_call(
        kernel,
        out_shape=out_shape,
        grid_spec=pltpu.PrefetchScalarGridSpec(
            num_scalar_prefetch=0,
            grid=grid,
            in_specs=in_specs,
            out_specs=out_specs,
        ),
        compiler_params=pltpu.CompilerParams(
            dimension_semantics=dims,
            vmem_limit_bytes=32 * 1024 * 1024),
    )(*args)

    if reduction == "mean":
        return jnp.sum(out) / (n * hw)
    elif reduction == "sum":
        return jnp.sum(out)
    else:  # 'none'
        return out.reshape(n, h, w)


def _reference(inputs, targets, mask=None, reduction="mean", alpha=1.0):
    c_t = targets.shape[1]
    log_p = jax.nn.log_softmax(inputs[:, :c_t], axis=1)
    q = jax.nn.softmax(targets * alpha, axis=1)
    loss = jnp.mean(log_p * q, axis=1)
    if mask is not None:
        loss = loss * mask.astype(jnp.float32)
    if reduction == "mean":
        return -jnp.mean(loss)
    elif reduction == "sum":
        return -jnp.sum(loss)
    return -loss


if __name__ == "__main__":
    key = jax.random.PRNGKey(0)
    k1, k2, k3 = jax.random.split(key, 3)

    N, C_IN, C_T, H, W = 2, 6, 4, 16, 16
    inputs = jax.random.normal(k1, (N, C_IN, H, W), jnp.float32)
    targets = jax.random.normal(k2, (N, C_T, H, W), jnp.float32)
    gt = jnp.zeros((N, H, W), jnp.int32)  # unused by forward
    mask = (jax.random.uniform(k3, (N, H, W)) > 0.3).astype(jnp.float32)

    # mean reduction, with mask
    out = jax.block_until_ready(
        knowledge_distillation_loss(inputs, targets, gt, mask,
                                    reduction="mean", alpha=1.0))
    ref = _reference(inputs, targets, mask, "mean", 1.0)
    assert jnp.allclose(out, ref, rtol=1e-5, atol=1e-5), (out, ref)

    # 'none' reduction, with mask, alpha != 1
    out_none = jax.block_until_ready(
        knowledge_distillation_loss(inputs, targets, gt, mask,
                                    reduction="none", alpha=2.0))
    ref_none = _reference(inputs, targets, mask, "none", 2.0)
    assert jnp.allclose(out_none, ref_none, rtol=1e-5, atol=1e-5)

    # sum reduction, no mask (exercises the mask-free kernel variant)
    out_sum = jax.block_until_ready(
        knowledge_distillation_loss(inputs, targets, gt, None,
                                    reduction="sum", alpha=1.0))
    ref_sum = _reference(inputs, targets, None, "sum", 1.0)
    assert jnp.allclose(out_sum, ref_sum, rtol=1e-5, atol=1e-5)

    print("KERNEL_OK")
</pallas_src>

<mosaic_0001>
module attributes {stable_mosaic.version = 11 : i64} {
  func.func @_kd_kernel(%arg0: i32, %arg1: i32, %arg2: memref<1x6x256xf32, #tpu.memory_space<vmem>>, %arg3: memref<1x4x256xf32, #tpu.memory_space<vmem>>, %arg4: memref<1x1x256xf32, #tpu.memory_space<vmem>>, %arg5: memref<1x1x256xf32, #tpu.memory_space<vmem>>) attributes {dimension_semantics = [#tpu.dimension_semantics<parallel>, #tpu.dimension_semantics<arbitrary>], iteration_bounds = array<i64: 2, 1>, scalar_prefetch = 0 : i64, scratch_operands = 0 : i64, tpu.core_type = #tpu.core_type<tc>, window_params = [{transform_indices = @transform_0, window_bounds = array<i64: 1, 6, 256>}, {transform_indices = @transform_1, window_bounds = array<i64: 1, 4, 256>}, {transform_indices = @transform_2, window_bounds = array<i64: 1, 1, 256>}, {transform_indices = @transform_3, window_bounds = array<i64: 1, 1, 256>}]} {
    %c0 = arith.constant 0 : index
    %c0_0 = arith.constant 0 : index
    %c0_1 = arith.constant 0 : index
    %0 = vector.load %arg2[%c0, %c0_0, %c0_1] : memref<1x6x256xf32, #tpu.memory_space<vmem>>, vector<1x4x256xf32>
    %1 = vector.shape_cast %0 : vector<1x4x256xf32> to vector<4x256xf32>
    %c0_2 = arith.constant 0 : index
    %c0_3 = arith.constant 0 : index
    %c0_4 = arith.constant 0 : index
    %2 = vector.load %arg3[%c0_2, %c0_3, %c0_4] : memref<1x4x256xf32, #tpu.memory_space<vmem>>, vector<1x4x256xf32>
    %3 = vector.shape_cast %2 : vector<1x4x256xf32> to vector<4x256xf32>
    %cst = arith.constant 1.000000e+00 : f32
    %4 = vector.broadcast %cst : f32 to vector<4x256xf32>
    %5 = arith.mulf %3, %4 : vector<4x256xf32>
    %cst_5 = arith.constant dense<0xFF800000> : vector<256xf32>
    %6 = vector.multi_reduction <maximumf>, %1, %cst_5 [0] : vector<4x256xf32> to vector<256xf32>
    %7 = vector.shape_cast %6 : vector<256xf32> to vector<1x256xf32>
    %8 = vector.broadcast %7 : vector<1x256xf32> to vector<4x256xf32>
    %9 = arith.subf %1, %8 : vector<4x256xf32>
    %10 = math.exp %9 : vector<4x256xf32>
    %cst_6 = arith.constant dense<0.000000e+00> : vector<256xf32>
    %11 = vector.multi_reduction <add>, %10, %cst_6 [0] : vector<4x256xf32> to vector<256xf32>
    %12 = vector.shape_cast %11 : vector<256xf32> to vector<1x256xf32>
    %13 = math.log %12 : vector<1x256xf32>
    %14 = vector.broadcast %13 : vector<1x256xf32> to vector<4x256xf32>
    %15 = arith.subf %9, %14 : vector<4x256xf32>
    %cst_7 = arith.constant dense<0xFF800000> : vector<256xf32>
    %16 = vector.multi_reduction <maximumf>, %5, %cst_7 [0] : vector<4x256xf32> to vector<256xf32>
    %17 = vector.shape_cast %16 : vector<256xf32> to vector<1x256xf32>
    %18 = vector.broadcast %17 : vector<1x256xf32> to vector<4x256xf32>
    %19 = arith.subf %5, %18 : vector<4x256xf32>
    %20 = math.exp %19 : vector<4x256xf32>
    %cst_8 = arith.constant dense<0.000000e+00> : vector<256xf32>
    %21 = vector.multi_reduction <add>, %20, %cst_8 [0] : vector<4x256xf32> to vector<256xf32>
    %22 = vector.shape_cast %21 : vector<256xf32> to vector<1x256xf32>
    %23 = arith.mulf %15, %20 : vector<4x256xf32>
    %cst_9 = arith.constant dense<0.000000e+00> : vector<256xf32>
    %24 = vector.multi_reduction <add>, %23, %cst_9 [0] : vector<4x256xf32> to vector<256xf32>
    %25 = vector.shape_cast %24 : vector<256xf32> to vector<1x256xf32>
    %cst_10 = arith.constant 0.000000e+00 : f32
    %26 = vector.broadcast %cst_10 : f32 to vector<1x256xf32>
    %27 = arith.subf %26, %25 : vector<1x256xf32>
    %cst_11 = arith.constant 4.000000e+00 : f32
    %28 = vector.broadcast %cst_11 : f32 to vector<1x256xf32>
    %29 = arith.mulf %22, %28 : vector<1x256xf32>
    %30 = arith.divf %27, %29 : vector<1x256xf32>
    %c0_12 = arith.constant 0 : index
    %c0_13 = arith.constant 0 : index
    %c0_14 = arith.constant 0 : index
    %31 = vector.load %arg4[%c0_12, %c0_13, %c0_14] : memref<1x1x256xf32, #tpu.memory_space<vmem>>, vector<1x1x256xf32>
    %32 = vector.shape_cast %31 : vector<1x1x256xf32> to vector<1x256xf32>
    %33 = arith.mulf %30, %32 : vector<1x256xf32>
    %c0_i32 = arith.constant 0 : i32
    %34 = arith.cmpi eq, %arg1, %c0_i32 : i32
    %35 = arith.extui %34 : i1 to i32
    %c0_i32_15 = arith.constant 0 : i32
    %36 = arith.cmpi ne, %35, %c0_i32_15 : i32
    scf.if %36 {
      %cst_22 = arith.constant 0.000000e+00 : f32
      %43 = vector.broadcast %cst_22 : f32 to vector<1x256xf32>
      %c0_23 = arith.constant 0 : index
      %c0_24 = arith.constant 0 : index
      %c0_25 = arith.constant 0 : index
      %44 = vector.load %arg5[%c0_23, %c0_24, %c0_25] : memref<1x1x256xf32, #tpu.memory_space<vmem>>, vector<1x1x256xf32>
      %45 = vector.shape_cast %44 : vector<1x1x256xf32> to vector<1x256xf32>
      %46 = vector.shape_cast %43 : vector<1x256xf32> to vector<1x1x256xf32>
      tpu.vector_store %arg5[%c0_23, %c0_24, %c0_25], %46 {strides = array<i32>} : memref<1x1x256xf32, #tpu.memory_space<vmem>>, vector<1x1x256xf32>,
    } else {
    }
    %c0_16 = arith.constant 0 : index
    %c0_17 = arith.constant 0 : index
    %c0_18 = arith.constant 0 : index
    %37 = vector.load %arg5[%c0_16, %c0_17, %c0_18] : memref<1x1x256xf32, #tpu.memory_space<vmem>>, vector<1x1x256xf32>
    %38 = vector.shape_cast %37 : vector<1x1x256xf32> to vector<1x256xf32>
    %39 = arith.addf %38, %33 : vector<1x256xf32>
    %c0_19 = arith.constant 0 : index
    %c0_20 = arith.constant 0 : index
    %c0_21 = arith.constant 0 : index
    %40 = vector.load %arg5[%c0_19, %c0_20, %c0_21] : memref<1x1x256xf32, #tpu.memory_space<vmem>>, vector<1x1x256xf32>
    %41 = vector.shape_cast %40 : vector<1x1x256xf32> to vector<1x256xf32>
    %42 = vector.shape_cast %39 : vector<1x256xf32> to vector<1x1x256xf32>
    tpu.vector_store %arg5[%c0_19, %c0_20, %c0_21], %42 {strides = array<i32>} : memref<1x1x256xf32, #tpu.memory_space<vmem>>, vector<1x1x256xf32>,
    return
  }
  func.func @transform_0(%arg0: i32, %arg1: i32) -> (i32, i32, i32) {
    %c0_i32 = arith.constant 0 : i32
    %c0_i32_0 = arith.constant 0 : i32
    return %arg0, %c0_i32, %arg1 : i32, i32, i32
  }
  func.func @transform_1(%arg0: i32, %arg1: i32) -> (i32, i32, i32) {
    %c0_i32 = arith.constant 0 : i32
    %c0_i32_0 = arith.constant 0 : i32
    return %arg0, %c0_i32, %arg1 : i32, i32, i32
  }
  func.func @transform_2(%arg0: i32, %arg1: i32) -> (i32, i32, i32) {
    %c0_i32 = arith.constant 0 : i32
    %c0_i32_0 = arith.constant 0 : i32
    return %arg0, %c0_i32, %arg1 : i32, i32, i32
  }
  func.func @transform_3(%arg0: i32, %arg1: i32) -> (i32, i32, i32) {
    %c0_i32 = arith.constant 0 : i32
    %c0_i32_0 = arith.constant 0 : i32
    %c0_i32_1 = arith.constant 0 : i32
    return %arg0, %c0_i32, %c0_i32_0 : i32, i32, i32
  }
}

</mosaic_0001>

<bundles_post_ra>
// kernel: tpu_custom_call.1
= control target key start
LH: loop header
LB: loop body
LE: loop exit
PB: predicated region body
PF: predicated region fallthrough
CT: control target
= control target key end

     0   :  { %8 = vsyncpa [#allocation3], 0  ;;  %s895_s0 = inlined_call_operand.vmem [shape: f32[2,6,256], index: 0, kind: input, shape index: {}]   ;;  %s896_s1 = inlined_call_operand.vmem [shape: f32[2,4,256], index: 1, kind: input, shape index: {}]   ;;  %s897_s2 = inlined_call_operand.vmem [shape: f32[2,1,256], index: 2, kind: input, shape index: {}]   ;;  %s898_s3 = inlined_call_operand.hbm [shape: f32[2,1,256], index: 3, kind: output, shape index: {}]  }
   0x1   :  { %10 = vsyncpa [#allocation3 + $0x1], 0  ;;  %s738_s12 = smov 0   ;;  %s740_s13 = smov 0  }
   0x2   :  { %s742_s14 = smov 0   ;;  %s744_s15 = smov 0  }
   0x3   :  { %s746_s16 = smov 0   ;;  %s748_s17 = smov 0  }
   0x4 LB: > { %s544_s18 = sadd.s32 4294967295, %s713_s17   ;;  %s545_s19 = sadd.s32 4294967294, %s713_s17   ;;  %s713_s17 = sphi %s748_s17, %s16_s17   ;;  %s709_s16 = sphi %s746_s16, %s907_s16   ;;  %s705_s15 = sphi %s744_s15, %s906_s15   ;;  %s701_s14 = sphi %s742_s14, %s905_s14   ;;  %s697_s13 = sphi %s740_s13, %s904_s13   ;;  %s693_s12 = sphi %s738_s12, %s903_s12  }
   0x5   : > { %s28_s20 = sadd.s32 1, %s709_s16  ;;  %s119_s21 = sadd.s32 1, %s701_s14 }
   0x6   : > { %p30_p0 = scmp.ge.s32.totalorder %s28_s20, 2  ;;  %p129_p1 = scmp.ne.s32.totalorder %s701_s14, %s697_s13 }
   0x7   : > { %p130_p2 = scmp.eq.s32.totalorder %s544_s18, 1  ;;  %p135_p3 = scmp.ne.s32.totalorder %s697_s13, %s693_s12 }
   0x8   : > { %s909_s20 = smov (%p30_p0, %s28_s20), 0  ;;  %p136_p5 = scmp.eq.s32.totalorder %s545_s19, 1 }
   0x9   : > { %p778_p4 = por %p130_p2, %p129_p1  ;;  %s116_s23 = ssub.s32 %s709_s16, %s909_s20 }
   0xa   : > { %p548_p6 = scmp.ge.s32.totalorder %s713_s17, 1  ;;  %p117_p7 = scmp.eq.s32.totalorder %s116_s23, 0 }
   0xb   : > { %p785_p8 = por %p136_p5, %p135_p3  ;;  %p192_p9 = scmp.lt.s32.totalorder %s713_s17, 3 }
   0xc   : > { %s791_s25 = scalar_select %p117_p7, %s701_s14, %s119_s21  }
   0xd   : > { %p193_p10 = pnand %p548_p6, %p192_p9 }
   0xe   : > { %s234_s26 = sand.u32 (!%p193_p10), 1, %s697_s13   ;;  %p238_p11 = scmp.lt.s32.totalorder (!%p193_p10), %s705_s15, 1  ;;  %v377_v0 = vlaneseq (!%p193_p10)  ;;  %v715_v3 = vmov (!%p193_p10), 0.0   ;;  %vm269_vm1 = vcmask (!%p193_p10), 1043456  }
   0xf   : > { %196 = sbr.rel (%p193_p10) target bundleno = 127 (0x7f), region = 32  ;;  %s549_s27 = sshll.u32 (!%p193_p10), %s234_s26, 1 }
  0x10   : > { %v797_v1 = vshrl.u32 (!%p193_p10), %v377_v0, 7  ;;  %vm799_vm0 = vcmp.lt.s32.totalorder (!%p193_p10), %v377_v0, 256  ;;  %s804_s29 = scalar_lea.vmem (!%p193_p10), [#allocation2], %s549_s27  ;;  %s562_s23 = sshll.u32 (!%p193_p10), %s705_s15, 5 }
  0x11   : > { %397 = vst.msk [vmem:[%s804_s29] sm:$0x3] (!%p193_p10), %vm799_vm0, %v715_v3  ;;  %s438_s27 = sshll.u32 (!%p193_p10), %s804_s29, 4  ;;  %s424_s5 = scalar_lea.sflag (!%p193_p10), [#allocation3], %s234_s26  ;;  %s845_s27 = int_to_ptr.vmem [resolvable:$true] %s438_s27 }
  0x12   : > { %v379_v4 = vsub.s32 (!%p193_p10), 0, %v797_v1  ;;  %v383_v5 = vsub.s32 (!%p193_p10), 1, %v797_v1  ;;  %s635_s6 = scalar_lea.vmem (!%p193_p10), %s845_s27, 32 }
  0x13   : > { %p636_p12 = scmp.ne.s32.totalorder (!%p193_p10), %s845_s27, %s635_s6 }
  0x15   : > { %p637_p13 = pnand (!%p193_p10), %p636_p12, %p778_p4 }
  0x16   : > { %s239_s28 = scalar_select %p238_p11, %s705_s15, 1 }
  0x17   : > { %p638_p0 = pneg %p637_p13  ;;  %s717_s15 = smov [#allocation2]  }
  0x18   : > { %s560_s30 = sshll.u32 %s239_s28, 4  ;;  %s561_s4 = sshll.u32 %s239_s28, 3 }
  0x19   : > { %s245_s7 = scalar_lea.vmem %s895_s0, %s560_s30  ;;  %s255_s10 = scalar_lea.vmem %s896_s1, %s561_s4 }
  0x1a   : > { %s554_s11 = sshll.u32 %s239_s28, 1  ;;  %v266_v6 = vld [vmem:[%s245_s7] sm:$0xf]  ;;  %v267_v7 = vld [vmem:[%s245_s7 + $0x8] sm:$0xf]  ;;  %s843_s4 = scalar_lea.hbm %s898_s3, %s562_s23 }
  0x1b   : > { %v268_v8 = vld [vmem:[%s255_s10] sm:$0xff]  ;;  %s264_s21 = scalar_lea.vmem %s897_s2, %s554_s11  ;;  %v270_v9 = vsel %vm269_vm1, %v266_v6, -inf  ;;  %v277_v10 = vsel %vm269_vm1, %v267_v7, -inf  ;;  %s639_s7 = sshll.u32 %s717_s15, 4  ;;  %s640_s7 = int_to_ptr.vmem [resolvable:$false] %s639_s7 }
  0x1c   : > { %v311_v11 = vcombine.high %v268_v8, %v268_v8  ;;  %v313_v12 = vsel %vm269_vm1, %v268_v8, -inf  ;;  %v271_v13 = vrot.slane %v270_v9, 4  ;;  %v278_v14 = vrot.slane %v277_v10, 4  ;;  %v375_v16 = vld [vmem:[%s264_s21] sm:$0x3]  ;;  %s641_s8 = scalar_lea.vmem %s640_s7, 64  ;;  %p642_p1 = scmp.lt.s32.totalorder %s845_s27, %s640_s7 }
  0x1d   : > { %v314_v15 = vrot.slane %v313_v12, 4  ;;  %v824_v18 = vrot.slane %v375_v16, %v379_v4  ;;  %v826_v19 = vrot.slane %v375_v16, %v383_v5  ;;  %p643_p2 = scmp.lt.s32.totalorder %s641_s8, %s635_s6 }
  0x1e   : > { %v320_v17 = vsel %vm269_vm1, %v311_v11, -inf  ;;  %v272_v20 = vmax.f32 %v270_v9, %v271_v13  ;;  %v279_v21 = vmax.f32 %v277_v10, %v278_v14 }
  0x1f   : > { %v315_v22 = vmax.f32 %v313_v12, %v314_v15  ;;  %v321_v23 = vrot.slane %v320_v17, 4  ;;  %p644_p3 = por %p643_p2, %p642_p1 }
  0x20   : > { %v273_v24 = vrot.slane %v272_v20, 2  ;;  %v280_v25 = vrot.slane %v279_v21, 2 }
  0x21   : > { %v316_v26 = vrot.slane %v315_v22, 2  ;;  %v322_v27 = vmax.f32 %v320_v17, %v321_v23  ;;  %p645_p5 = pnand %p644_p3, %p638_p0 }
  0x22   : > { %v274_v28 = vmax.f32 %v272_v20, %v273_v24  ;;  %v281_v29 = vmax.f32 %v279_v21, %v280_v25 }
  0x23   : > { %v317_v30 = vmax.f32 %v315_v22, %v316_v26  ;;  %v323_v31 = vrot.slane %v322_v27, 2 }
  0x24   : > { %v275_v32 = vrot.slane %v274_v28, 1  ;;  %v282_v33 = vrot.slane %v281_v29, 1 }
  0x25   : > { %v318_v34 = vrot.slane %v317_v30, 1  ;;  %v324_v35 = vmax.f32 %v322_v27, %v323_v31 }
  0x26   : > { %v276_v36 = vmax.f32 %v274_v28, %v275_v32  ;;  %v283_v37 = vmax.f32 %v281_v29, %v282_v33 }
  0x27   : > { %v319_v38 = vmax.f32 %v317_v30, %v318_v34  ;;  %v325_v39 = vrot.slane %v324_v35, 1 }
  0x28   : > { %v284_v40 = vsub.f32 %v266_v6, %v276_v36  ;;  %v285_v41 = vsub.f32 %v267_v7, %v283_v37 }
  0x29   : > { %v326_v42 = vmax.f32 %v324_v35, %v325_v39 }
  0x2a   : > { %v286_v43 = vmul.f32 1.442695, %v284_v40  ;;  %v288_v44 = vmul.f32 1.442695, %v285_v41 }
  0x2b   : > { %v329_v45 = vcombine.low %v319_v38, %v326_v42  ;;  %v716_v42 = vmov 1966171168  }
  0x2c   : > { %621 = vpow2.f32 %v286_v43  ;;  %v403_v43 = vunpack.c.l.s4 %v716_v42 }
  0x2d   : > { %v331_v46 = vsub.f32 %v268_v8, %v329_v45  ;;  %623 = vpow2.f32 %v288_v44 }
  0x2f   : > { %v332_v47 = vmul.f32 1.442695, %v331_v46 }
  0x31   : > { %625 = vpow2.f32 %v332_v47 }
  0x36   : > { %v622_v48 = vpop.eup %621 }
  0x37   : > { %v624_v49 = vpop.eup %623  ;;  %v290_v50 = vsel %vm269_vm1, %v622_v48, 0.0 }
  0x38   : > { %v291_v51 = vrot.slane %v290_v50, 4  ;;  %v297_v52 = vsel %vm269_vm1, %v624_v49, 0.0 }
  0x39   : > { %v298_v53 = vrot.slane %v297_v52, 4 }
  0x3a   : > { %v292_v55 = vadd.f32 %v291_v51, %v290_v50  ;;  %v404_v50 = vunpack.c.0.s8 %v403_v43 }
  0x3b   : > { %v626_v54 = vpop.eup %625  ;;  %v299_v56 = vadd.f32 %v298_v53, %v297_v52 }
  0x3c   : > { %v335_v57 = vcombine.high %v626_v54, %v626_v54  ;;  %v337_v58 = vsel %vm269_vm1, %v626_v54, 0.0  ;;  %v293_v59 = vrot.slane %v292_v55, 2 }
  0x3d   : > { %v338_v60 = vrot.slane %v337_v58, 4  ;;  %v300_v61 = vrot.slane %v299_v56, 2 }
  0x3e   : > { %v344_v62 = vsel %vm269_vm1, %v335_v57, 0.0  ;;  %v294_v63 = vadd.f32 %v293_v59, %v292_v55  ;;  %v407_v55 = vsub.s32 %v404_v50, %v797_v1 }
  0x3f   : > { %v345_v0 = vrot.slane %v344_v62, 4  ;;  %v301_v3 = vadd.f32 %v300_v61, %v299_v56  ;;  %v339_v4 = vadd.f32 %v338_v60, %v337_v58  ;;  %v398_v58 = vld [vmem:[%s804_s29] sm:$0x3] }
  0x40   : > { %v295_v5 = vrot.slane %v294_v63, 1 }
  0x41   : > { %v346_v6 = vadd.f32 %v345_v0, %v344_v62  ;;  %v302_v7 = vrot.slane %v301_v3, 1  ;;  %v340_v10 = vrot.slane %v339_v4, 2 }
  0x42   : > { %v296_v8 = vadd.f32 %v295_v5, %v294_v63 }
  0x43   : > { %v303_v9 = vadd.f32 %v302_v7, %v301_v3  ;;  %v347_v11 = vrot.slane %v346_v6, 2  ;;  %v341_v12 = vadd.f32 %v340_v10, %v339_v4 }
  0x44   : > { %627 = vlog2.f32 %v296_v8 }
  0x45   : > { %629 = vlog2.f32 %v303_v9  ;;  %v348_v13 = vadd.f32 %v347_v11, %v346_v6  ;;  %v342_v14 = vrot.slane %v341_v12, 1 }
  0x47   : > { %v349_v15 = vrot.slane %v348_v13, 1  ;;  %v343_v21 = vadd.f32 %v342_v14, %v341_v12 }
  0x49   : > { %v350_v23 = vadd.f32 %v349_v15, %v348_v13  ;;  %v369_v27 = vmul.f32 4.0, %v343_v21 }
  0x4b   : > { %v370_v29 = vmul.f32 4.0, %v350_v23  ;;  %631 = vrcp.f32 %v369_v27 }
  0x4d   : > { %633 = vrcp.f32 %v370_v29 }
  0x4e   : > { %v628_v16 = vpop.eup %627 }
  0x4f   : > { %v630_v17 = vpop.eup %629  ;;  %v305_v20 = vmul.f32 0.6931472, %v628_v16 }
  0x50   : > { %v307_v22 = vmul.f32 0.6931472, %v630_v17 }
  0x51   : > { %v308_v24 = vsub.f32 %v284_v40, %v305_v20 }
  0x52   : > { %v309_v25 = vsub.f32 %v285_v41, %v307_v22 }
  0x53   : > { %v351_v26 = vmul.f32 %v626_v54, %v308_v24 }
  0x54   : > { %v352_v28 = vmul.f32 %v335_v57, %v309_v25 }
  0x55   : > { %v353_v30 = vsel %vm269_vm1, %v351_v26, 0.0  ;;  %v632_v45 = vpop.eup %631 }
  0x56   : > { %v354_v31 = vrot.slane %v353_v30, 4  ;;  %v360_v32 = vsel %vm269_vm1, %v352_v28, 0.0 }
  0x57   : > { %v361_v33 = vrot.slane %v360_v32, 4  ;;  %v634_v47 = vpop.eup %633 }
  0x58   : > { %v355_v34 = vadd.f32 %v354_v31, %v353_v30 }
  0x59   : > { %v362_v35 = vadd.f32 %v361_v33, %v360_v32 }
  0x5a   : > { %v356_v36 = vrot.slane %v355_v34, 2 }
  0x5b   : > { %v363_v37 = vrot.slane %v362_v35, 2 }
  0x5c   : > { %v357_v38 = vadd.f32 %v356_v36, %v355_v34 }
  0x5d   : > { %v364_v39 = vadd.f32 %v363_v37, %v362_v35 }
  0x5e   : > { %v358_v40 = vrot.slane %v357_v38, 1 }
  0x5f   : > { %v365_v41 = vrot.slane %v364_v39, 1 }
  0x60   : > { %v359_v44 = vadd.f32 %v358_v40, %v357_v38 }
  0x61   : > { %v366_v46 = vadd.f32 %v365_v41, %v364_v39 }
  0x62   : > { %v367_v48 = vsub.f32 0.0, %v359_v44 }
  0x63   : > { %v368_v49 = vsub.f32 0.0, %v366_v46 }
  0x64   : > { %v372_v51 = vmul.f32 %v632_v45, %v367_v48 }
  0x65   : > { %v374_v52 = vmul.f32 %v634_v47, %v368_v49 }
  0x66   : > { %v387_v53 = vmul.f32 %v824_v18, %v372_v51 }
  0x67   : > { %v388_v54 = vmul.f32 %v826_v19, %v374_v52 }
  0x69   : > { %v401_v56 = vcombine.low %v387_v53, %v388_v54 }
  0x6b   : > { %v408_v57 = vrot.slane %v401_v56, %v407_v55 }
  0x6d   : > { %v415_v59 = vrot.slane %v408_v57, %v407_v55 }
  0x6f   : > { %v417_v60 = vadd.f32 %v415_v59, %v398_v58 }
  0x71   : > { %422 = vst.msk [vmem:[%s804_s29] sm:$0x3] %vm799_vm0, %v417_v60 }
  0x72   : > { %648 = shalt.err (!%p645_p5)
}
  0x73   : > { %s649_s26 = scalar_lea.hbm %s843_s4, 32  ;;  %s653_s10 = scalar_lea.hbm %s898_s3, 64 }
  0x74   : > { %p650_p6 = scmp.ne.s32.totalorder %s843_s4, %s649_s26  ;;  %p654_p10 = scmp.lt.u32.totalorder %s843_s4, %s898_s3 }
  0x75   : > { %p655_p11 = scmp.lt.u32.totalorder %s653_s10, %s649_s26  ;;  %p657_p13 = scmp.lt.u32.totalorder %s649_s26, %s843_s4 }
  0x76   : > { %p651_p7 = pnand %p650_p6, %p778_p4 }
  0x77   : > { %p656_p12 = por %p655_p11, %p654_p10 }
  0x78   : > { %p652_p9 = pneg %p651_p7 }
  0x79   : > { %p658_p0 = por %p657_p13, %p656_p12 }
  0x7b   : > { %p659_p1 = pnand %p658_p0, %p652_p9 }
  0x7d   : > { %662 = shalt.err (!%p659_p1)
}
  0x7e   : > { %563 = dma.vmem_to_hbm [thread:$0]  (%p778_p4), %s845_s27, 32, %s843_s4, %s424_s5  }
  0x7f PF: > { %p569_p2 = scmp.ge.s32.totalorder %s713_s17, 2  ;;  %s450_s19 = sand.u32 1, %s693_s12  }
  0x80   : > { %s451_s21 = scalar_lea.sflag [#allocation3], %s450_s19 }
  0x81   : > { %p566_p3 = pnand %p569_p2, %p785_p8 }
  0x83   : > { %688 = dma.done.wait (!%p566_p3), %s451_s21, 32  }
  0x84   : > { %690 = vsyncadd (!%p566_p3), %s451_s21, 4294967264  ;;  %s16_s17 = sadd.s32 1, %s713_s17   ;;  %s903_s12 = smov %s697_s13 }
  0x85   : > { %p13_p5 = scmp.ge.s32.totalorder %s16_s17, 4   ;;  %s904_s13 = smov %s701_s14 }
  0x86   : > { %s905_s14 = smov %s791_s25  ;;  %s906_s15 = smov %s709_s16 }
  0x87   : > { %s907_s16 = smov %s909_s20  ;;  %15 = sbr.rel (!%p13_p5) target bundleno = 4 (0x4), region = 77 }
  0x8e   :  { %456 = vsyncpa [#allocation3], 1 }
  0x8f   :  { %458 = vsyncpa [#allocation3 + $0x1], 1 }

</bundles_post_ra>
